<compile_context>
chip_gen: v7x
topology: tpu7x:2x2x1
jax: 0.10.0
libtpu: 0.0.40
codegen_flags: <defaults>
</compile_context>

<pallas_src>
import functools

import jax
import jax.numpy as jnp
from jax.experimental import pallas as pl
from jax.experimental.pallas import tpu as pltpu


def _round_up(v, m):
    return -(-v // m) * m


def _pick_tile_m(M, K, Dp):
    """Largest M tile fitting a conservative VMEM budget; prefer exact divisors of M."""
    budget = 24 * 1024 * 1024                 # stay under the 32 MiB default scoped VMEM
    resident = K * Dp * 2 + Dp * 4            # bf16 weight + f32 bias (single-buffered)
    per_row = 2 * (K * 2) + 2 * (Dp * 4)      # double-buffered bf16 input + f32 output rows
    cap = max((budget - resident) // per_row, 8)
    cap = int(min(cap, 1024))
    cap -= cap % 8
    if M <= cap:
        return _round_up(max(M, 8), 8)
    for t in range(cap, 127, -8):             # biggest multiple-of-8 divisor of M
        if M % t == 0:
            return t
    return min(512, cap)                      # fall back to a padded last tile


def _patch_embed_kernel(p_ref, w_ref, b_ref, o_ref):
    # p_ref: (TILE_M, K) bf16    w_ref: (K, Dp) bf16 (VMEM-resident)
    # b_ref: (1, Dp)      f32    o_ref: (TILE_M, Dp)
    acc = jnp.dot(p_ref[...], w_ref[...], preferred_element_type=jnp.float32)
    o_ref[...] = (acc + b_ref[...]).astype(o_ref.dtype)


@functools.partial(jax.jit, static_argnames=("patch_size",))
def patch_embedding(x, weight, bias, patch_size):
    """x: (B, C, H, W) NCHW. weight: (D, C, P, P) conv weight. bias: (D,)."""
    B, C, H, W = x.shape
    D = weight.shape[0]
    P = patch_size
    assert H % P == 0 and W % P == 0
    Gh, Gw = H // P, W // P
    num_patches = Gh * Gw

    out_dtype = x.dtype
    M = B * num_patches
    K = C * P * P
    Dp = _round_up(D, 128)                    # lane-dense output stores

    TILE_M = _pick_tile_m(M, K, Dp)
    Mp = _round_up(M, TILE_M)

    # --- glue: patchify in bf16 (wrapper-side layout plumbing) ---
    # TODO(synk): fold the patchify transpose into the pallas_call prologue
    # (in-kernel band gather) to drop this extra HBM pass entirely.
    xc = x.astype(jnp.bfloat16)
    patches = xc.reshape(B, C, Gh, P, Gw, P)
    patches = patches.transpose(0, 2, 4, 1, 3, 5)        # (B, Gh, Gw, C, P, P)
    patches = patches.reshape(M, K)
    if Mp != M:
        patches = jnp.pad(patches, ((0, Mp - M), (0, 0)))

    # conv weight (D, C, P, P) -> (K, D) bf16, lane-padded to (K, Dp).
    w_mat = weight.reshape(D, K).T.astype(jnp.bfloat16)
    b_mat = bias.astype(jnp.float32).reshape(1, D)
    if Dp != D:
        w_mat = jnp.pad(w_mat, ((0, 0), (0, Dp - D)))
        b_mat = jnp.pad(b_mat, ((0, 0), (0, Dp - D)))

    out_itemsize = jnp.dtype(out_dtype).itemsize
    cost = pl.CostEstimate(
        flops=2 * Mp * K * Dp,
        transcendentals=0,
        bytes_accessed=Mp * K * 2 + K * Dp * 2 + Dp * 4 + Mp * Dp * out_itemsize,
    )

    out = pl.pallas_call(
        _patch_embed_kernel,
        out_shape=jax.ShapeDtypeStruct((Mp, Dp), out_dtype),
        grid=(Mp // TILE_M,),
        in_specs=[
            pl.BlockSpec((TILE_M, K), lambda i: (i, 0)),   # patch tile (pipelined)
            pl.BlockSpec((K, Dp), lambda i: (0, 0)),       # weight (resident)
            pl.BlockSpec((1, Dp), lambda i: (0, 0)),       # bias (resident)
        ],
        out_specs=pl.BlockSpec((TILE_M, Dp), lambda i: (i, 0)),
        compiler_params=pltpu.CompilerParams(
            dimension_semantics=("parallel",),
        ),
        cost_estimate=cost,
    )(patches, w_mat, b_mat)

    # Strip padding (no-op for aligned ViT shapes): (Mp, Dp) -> (B, num_patches, D).
    if Mp != M or Dp != D:
        out = out[:M, :D]
    return out.reshape(B, num_patches, D)


if __name__ == "__main__":
    # Small shapes consistent with the module.
    B, C, IMG, PATCH, EMB = 2, 4, 16, 4, 32

    key = jax.random.PRNGKey(0)
    kx, kw, kb = jax.random.split(key, 3)

    x = jax.random.normal(kx, (B, C, IMG, IMG), dtype=jnp.float32)
    # Deterministic synthetic conv parameters (shapes from nn.Conv2d).
    weight = jax.random.normal(kw, (EMB, C, PATCH, PATCH), dtype=jnp.float32) * 0.02
    bias = jax.random.normal(kb, (EMB,), dtype=jnp.float32) * 0.02

    out = patch_embedding(x, weight, bias, PATCH)
    out = jax.block_until_ready(out)

    # Pure-JAX f32 reference of the same math (kernel uses bf16 operands with
    # f32 accumulation, so compare with a bf16-appropriate tolerance).
    Gh = IMG // PATCH
    ref_p = x.reshape(B, C, Gh, PATCH, Gh, PATCH).transpose(0, 2, 4, 1, 3, 5)
    ref_p = ref_p.reshape(B * Gh * Gh, C * PATCH * PATCH)
    ref = (ref_p @ weight.reshape(EMB, -1).T + bias).reshape(B, Gh * Gh, EMB)

    assert out.shape == (B, Gh * Gh, EMB)
    assert jnp.allclose(out, ref, atol=2e-2, rtol=2e-2), float(
        jnp.max(jnp.abs(out - ref))
    )

    print("KERNEL_OK")
</pallas_src>

<mosaic_0001>
module attributes {stable_mosaic.version = 11 : i64} {
  func.func @_patch_embed_kernel(%arg0: i32, %arg1: memref<32x64xbf16, #tpu.memory_space<vmem>>, %arg2: memref<64x128xbf16, #tpu.memory_space<vmem>>, %arg3: memref<1x128xf32, #tpu.memory_space<vmem>>, %arg4: memref<32x128xf32, #tpu.memory_space<vmem>>) attributes {dimension_semantics = [#tpu.dimension_semantics<parallel>], iteration_bounds = array<i64: 1>, scalar_prefetch = 0 : i64, scratch_operands = 0 : i64, tpu.core_type = #tpu.core_type<tc>, window_params = [{transform_indices = @transform_0, window_bounds = array<i64: 32, 64>}, {pipeline_mode = #tpu.pipeline_mode<synchronous>, transform_indices = @transform_1, window_bounds = array<i64: 64, 128>}, {pipeline_mode = #tpu.pipeline_mode<synchronous>, transform_indices = @transform_2, window_bounds = array<i64: 1, 128>}, {transform_indices = @transform_3, window_bounds = array<i64: 32, 128>}]} {
    %c0 = arith.constant 0 : index
    %c0_0 = arith.constant 0 : index
    %0 = vector.load %arg1[%c0, %c0_0] : memref<32x64xbf16, #tpu.memory_space<vmem>>, vector<32x64xbf16>
    %c0_1 = arith.constant 0 : index
    %c0_2 = arith.constant 0 : index
    %1 = vector.load %arg2[%c0_1, %c0_2] : memref<64x128xbf16, #tpu.memory_space<vmem>>, vector<64x128xbf16>
    %cst = arith.constant dense<0.000000e+00> : vector<32x128xf32>
    %2 = tpu.matmul %0, %1, %cst {dimension_numbers = #tpu.dot_dimension_numbers<[1], [0], [0], [1], [0, 0, 1, 1], [], []>} : vector<32x64xbf16>, vector<64x128xbf16>, vector<32x128xf32> -> vector<32x128xf32>
    %c0_3 = arith.constant 0 : index
    %c0_4 = arith.constant 0 : index
    %3 = vector.load %arg3[%c0_3, %c0_4] : memref<1x128xf32, #tpu.memory_space<vmem>>, vector<1x128xf32>
    %4 = vector.broadcast %3 : vector<1x128xf32> to vector<32x128xf32>
    %5 = arith.addf %2, %4 : vector<32x128xf32>
    %c0_5 = arith.constant 0 : index
    %c0_6 = arith.constant 0 : index
    %6 = vector.load %arg4[%c0_5, %c0_6] : memref<32x128xf32, #tpu.memory_space<vmem>>, vector<32x128xf32>
    tpu.vector_store %arg4[%c0_5, %c0_6], %5 {strides = array<i32>} : memref<32x128xf32, #tpu.memory_space<vmem>>, vector<32x128xf32>,
    return
  }
  func.func @transform_0(%arg0: i32) -> (i32, i32) {
    %c0_i32 = arith.constant 0 : i32
    %c0_i32_0 = arith.constant 0 : i32
    return %arg0, %c0_i32 : i32, i32
  }
  func.func @transform_1(%arg0: i32) -> (i32, i32) {
    %c0_i32 = arith.constant 0 : i32
    %c0_i32_0 = arith.constant 0 : i32
    %c0_i32_1 = arith.constant 0 : i32
    return %c0_i32, %c0_i32_0 : i32, i32
  }
  func.func @transform_2(%arg0: i32) -> (i32, i32) {
    %c0_i32 = arith.constant 0 : i32
    %c0_i32_0 = arith.constant 0 : i32
    %c0_i32_1 = arith.constant 0 : i32
    return %c0_i32, %c0_i32_0 : i32, i32
  }
  func.func @transform_3(%arg0: i32) -> (i32, i32) {
    %c0_i32 = arith.constant 0 : i32
    %c0_i32_0 = arith.constant 0 : i32
    return %arg0, %c0_i32 : i32, i32
  }
}

</mosaic_0001>

<bundles_post_ra>
// kernel: patch_embedding.1
= control target key start
LH: loop header
LB: loop body
LE: loop exit
PB: predicated region body
PF: predicated region fallthrough
CT: control target
= control target key end

     0   :  { %vm69_vm0 = vcmask 523264   ;;  %s261_s0 = inlined_call_operand.vmem [shape: bf16[32,64], index: 0, kind: input, shape index: {}]   ;;  %s262_s1 = inlined_call_operand.vmem [shape: bf16[64,128], index: 1, kind: input, shape index: {}]   ;;  %s263_s2 = inlined_call_operand.vmem [shape: f32[1,128], index: 2, kind: input, shape index: {}]   ;;  %s264_s3 = inlined_call_operand.hbm [shape: f32[32,128], index: 3, kind: output, shape index: {}]  }
   0x1   :  { %v175_v0 = vld [vmem:[%s262_s1] sm:$0xff]   ;;  %v176_v1 = vld [vmem:[%s262_s1 + $0x8] sm:$0xff]   ;;  %v177_v2 = vld [vmem:[%s262_s1 + $0x10] sm:$0xff]  }
   0x2   :  { %160 = vmatprep.subr.bf16.mxu0 %v175_v0  ;;  %v179_v3 = vld [vmem:[%s261_s0] sm:$0xff]  }
   0x3   :  { %161 = vmatpush3.bf16.msra.mxu0 %v175_v0  ;;  %168 = vmatprep.mubr.msk.bf16.mxu0 %vm69_vm0, %v179_v3 }
   0x4   :  { %162 = vmatprep.subr.bf16.mxu0 %v176_v1 }
   0x5   :  { %8 = vsyncpa [#allocation3], 0  ;;  %v178_v4 = vld [vmem:[%s262_s1 + $0x18] sm:$0xff]   ;;  %v180_v5 = vld [vmem:[%s261_s0 + $0x8] sm:$0xff]   ;;  %s205_s26 = smov [#allocation2]  }
   0x6   :  { %v145_v6 = vld [vmem:[%s263_s2] ss:$0 sm:$0xff]  ;;  %s134_s27 = sshll.u32 %s205_s26, 4  ;;  %s135_s27 = int_to_ptr.vmem [resolvable:$true] %s134_s27 }
   0x7   :  { %163 = vmatpush3.bf16.msra.mxu0 %v176_v1  ;;  %s181_s0 = scalar_lea.vmem %s135_s27, 512  ;;  %p186_p1 = scmp.lt.s32.totalorder %s135_s27, %s135_s27 }
   0x8   :  { %164 = vmatprep.subr.bf16.mxu0 %v177_v2  ;;  %p182_p0 = scmp.ne.s32.totalorder %s135_s27, %s181_s0  ;;  %p187_p2 = scmp.lt.s32.totalorder %s181_s0, %s181_s0 }
   0xa   :  { %p188_p3 = por %p187_p2, %p186_p1 }
   0xb   :  { %165 = vmatpush3.bf16.msra.mxu0 %v177_v2 }
   0xc   :  { %166 = vmatprep.subr.bf16.mxu0 %v178_v4  ;;  %p189_p4 = pnand %p188_p3, %p182_p0 }
   0xf   :  { %167 = vmatpush3.bf16.msra.mxu0 %v178_v4 }
  0x12   :  { %169 = vmatmul.mubr.msk.bf16.vlgmr.msra.gmra.mrb[0].mxu0 %vm69_vm0, %v180_v5 }
  0xe5   :  { %v170_v7 = vpop.f32.mrb[0].mxu0 }
  0xe6   :  { %v119_v8 = vadd.f32 %v170_v7, %v145_v6  ;;  %v110_v9 = vpop.f32.mrb[1].mxu0 }
  0xe7   :  { %v111_v10 = vadd.f32 %v145_v6, %v110_v9  ;;  %v171_v11 = vpop.f32.mrb[2].mxu0 }
  0xe8   :  { %127 = vst [vmem:[#allocation2 + $0x10] sm:$0xff] %v119_v8  ;;  %v122_v12 = vadd.f32 %v171_v11, %v145_v6  ;;  %v113_v13 = vpop.f32.mrb[3].mxu0 }
  0xe9   :  { %125 = vst [vmem:[#allocation2] sm:$0xff] %v111_v10  ;;  %v114_v14 = vadd.f32 %v145_v6, %v113_v13 }
  0xea   :  { %128 = vst [vmem:[#allocation2 + $0x18] sm:$0xff] %v122_v12 }
  0xeb   :  { %126 = vst [vmem:[#allocation2 + $0x8] sm:$0xff] %v114_v14 }
  0xec   :  { %192 = shalt.err (!%p189_p4)
}
  0xed   :  { %s193_s28 = scalar_lea.hbm %s264_s3, 512 }
  0xee   :  { %p194_p5 = scmp.ne.s32.totalorder %s264_s3, %s193_s28  ;;  %p197_p6 = scmp.lt.u32.totalorder %s193_s28, %s264_s3 }
  0xf0   :  { %p199_p7 = pnand %p197_p6, %p194_p5 }
  0xf2   :  { %202 = shalt.err (!%p199_p7)
}
  0xf3   :  { %s206_s6 = smov 128   ;;  %s207_s7 = smov 8  }
  0xf4   :  { %140 = dma.vmem_to_hbm [thread:$0]  %s135_s27, 512, %s264_s3, [#allocation3], %s206_s6, %s206_s6, %s207_s7  }
  0xf5   :  { %203 = dma.done.wait [#allocation3], 512  }
  0xf6   :  { %204 = vsyncadd [#allocation3], 4294966784 }
  0xf7   :  { %144 = vsyncpa [#allocation3], 1 }

</bundles_post_ra>
